<compile_context>
chip_gen: v7x
topology: tpu7x:2x2x1
jax: 0.10.0
libtpu: 0.0.40
codegen_flags: <defaults>
</compile_context>

<pallas_src>
import numpy as np

import jax
import jax.numpy as jnp
from jax.experimental import pallas as pl
from jax.experimental.pallas import tpu as pltpu

# --- constants from the PyTorch module ---------------------------------------
C = [0.17393044, 0.15653739, 0.14088365, 0.12679529, 5.51975209,
     4.96777688, 4.4709992, -1.44776001, -1.30298401, 46.05483778]
MAX_ORDER = int((2 * len(C)) ** 0.5 - 1)   # = 3
NPOW = MAX_ORDER + 1                       # = 4 powers of y / dm
X_MAX = 0.9
OFFSET = 0.45


def _grouped_coeffs():
    # coef_i = sum_j c[idx(i,j)] * X_MAX**j  (the j-sum distributes out of the matmul,
    # so grouping per power-of-y i is mathematically identical to the reference).
    coefs, idx = [], 0
    for i in range(MAX_ORDER + 1):
        s = 0.0
        for j in range(MAX_ORDER - i + 1):
            s += C[idx] * (X_MAX ** j)
            idx += 1
        coefs.append(float(s))
    return coefs


COEFS = _grouped_coeffs()


# --- Pallas kernels -----------------------------------------------------------
def _qk_kernel(x_ref, rhs_ref, dm_ref, o_ref):
    # x_ref: (gb, tm, K); rhs_ref: (gb, K, tn) = poly(y - OFFSET), precomputed;
    # dm_ref: (tm, tn).  One MXU matmul + one VPU multiply per tile.
    acc = jnp.einsum('gmk,gkn->gmn', x_ref[...], rhs_ref[...],
                     preferred_element_type=jnp.float32)
    o_ref[...] = (acc * dm_ref[...][None]).astype(o_ref.dtype)


def _av_kernel(x_ref, yp_ref, dmp_ref, o_ref, acc_ref):
    # x_ref  : (gb, tm, tk)
    # yp_ref : (gb, NPOW, tk, tn)   plane i = COEFS[i] * (y - OFFSET)**i   (precomputed)
    # dmp_ref: (NPOW-1, tm, tk)     plane i = decay_mask**(i+1)            (precomputed)
    # acc_ref: (gb, tm, tn) f32 scratch accumulated over the k grid axis.
    k = pl.program_id(3)

    @pl.when(k == 0)
    def _init():
        acc_ref[...] = jnp.zeros_like(acc_ref)

    x = x_ref[...]
    yp = yp_ref[...]
    dmp = dmp_ref[...]

    acc = acc_ref[...]
    for i in range(NPOW):                                   # static unroll, NPOW = 4
        xi = x if i == 0 else x * dmp[i - 1][None]
        acc = acc + jnp.einsum('gmk,gkn->gmn', xi, yp[:, i],
                               preferred_element_type=jnp.float32)
    acc_ref[...] = acc

    @pl.when(k == pl.num_programs(3) - 1)
    def _finalize():
        o_ref[...] = acc_ref[...].astype(o_ref.dtype)


# --- wrapper helpers ----------------------------------------------------------
def _vmem_limit_bytes():
    """Scoped-VMEM window to request, derived from this generation's capacity."""
    cap = 64 * 1024 * 1024                      # conservative fallback (v7x per-TC)
    try:
        info = pltpu.get_tpu_info()
        cap = int(getattr(info, "vmem_capacity_bytes", cap) or cap)
    except Exception:
        pass
    # ~48 MiB on v7x (64 MiB physical), ~96 MiB on v5e/v6e (128 MiB physical).
    return int(min(cap * 3 // 4, 96 * 1024 * 1024))


def _divisor_tile(dim, candidates, align):
    # Either a divisor of `dim` that is a multiple of `align`, or the full extent
    # (full extent is always legal under the (8,128) block rule).
    for c in candidates:
        if c < dim and dim % c == 0 and c % align == 0:
            return c
    return dim


def _pad_last(a, target):
    pad = target - a.shape[-1]
    if pad == 0:
        return a
    return jnp.pad(a, [(0, 0)] * (a.ndim - 1) + [(0, pad)])


def _pick_gb(G, fits):
    for gb in range(min(G, 8), 0, -1):
        if G % gb == 0 and fits(gb):
            return gb
    return 1


# --- wrapper ------------------------------------------------------------------
def dram_mac_temporal_encoding(x, y, qk_mul, decay_mask, *, mxu_dtype=None):
    """x: (G, M, K), y: (G, K, N), decay_mask: 2-D (see layout comment)."""
    G, M, K = x.shape
    G2, K2, N = y.shape
    assert G == G2 and K == K2
    qk_mul = bool(qk_mul)

    out_dtype = x.dtype
    cdtype = jnp.dtype(mxu_dtype) if mxu_dtype is not None else jnp.dtype(x.dtype)
    isz = np.dtype(cdtype).itemsize
    out_isz = np.dtype(out_dtype).itemsize

    # Lane-dense output: zero-pad N to a multiple of 128; slice back at the end.
    Np = ((N + 127) // 128) * 128

    vmem_limit = _vmem_limit_bytes()
    budget = vmem_limit - 4 * 1024 * 1024       # headroom for Mosaic internal scratch

    x_c = x.astype(cdtype)
    yf = y.astype(jnp.float32) - OFFSET

    if qk_mul:
        # rhs = c0 + yf*(c1 + yf*(c2 + yf*c3)) hoisted out of the steady-state loop.
        rhs = yf * COEFS[MAX_ORDER] + COEFS[MAX_ORDER - 1]
        for i in range(MAX_ORDER - 2, -1, -1):
            rhs = rhs * yf + COEFS[i]
        rhs = _pad_last(rhs.astype(cdtype), Np)

        # dm multiplies the f32 accumulator; keep f32 for f32 outputs, otherwise cast
        # to the output dtype to halve its re-streamed DMA traffic.
        dm_dtype = jnp.float32 if np.dtype(out_dtype) == np.float32 else out_dtype
        dm_p = _pad_last(decay_mask.astype(dm_dtype), Np)
        dm_isz = np.dtype(dm_dtype).itemsize

        def step_bytes(gb, tm, tn):
            blocks = (gb * tm * K * isz + gb * K * tn * isz
                      + gb * tm * tn * out_isz + tm * tn * dm_isz)
            temps = 2 * gb * tm * tn * 4          # f32 accumulator + dm-scaled result
            return 2 * blocks + temps             # BlockSpec buffers are double-buffered

        tm = tn = None
        gb = 1
        for tm_c, tn_c in (((512, 256, 128), (512, 256, 128)),
                           ((256, 128), (256, 128)),
                           ((128, 64, 32, 16, 8), (128,))):
            tm = _divisor_tile(M, tm_c, 8)
            tn = _divisor_tile(Np, tn_c, 128)
            gb = _pick_gb(G, lambda g: step_bytes(g, tm, tn) <= budget)
            if step_bytes(gb, tm, tn) <= budget:
                break
        # TODO(synk): K (head_dim) stays untiled in the QK path; tile it like the AV
        # path if head_dim ever grows past ~1K.
        # TODO(synk): a (m, n, g) grid order would keep the dm tile resident across the
        # g sweep if this path ever becomes DMA-bound on decay_mask traffic.

        grid = (G // gb, M // tm, Np // tn)
        out = pl.pallas_call(
            _qk_kernel,
            out_shape=jax.ShapeDtypeStruct((G, M, Np), out_dtype),
            grid=grid,
            in_specs=[
                pl.BlockSpec((gb, tm, K), lambda g, m, n: (g, m, 0)),
                pl.BlockSpec((gb, K, tn), lambda g, m, n: (g, 0, n)),
                pl.BlockSpec((tm, tn), lambda g, m, n: (m, n)),
            ],
            out_specs=pl.BlockSpec((gb, tm, tn), lambda g, m, n: (g, m, n)),
            compiler_params=pltpu.CompilerParams(
                dimension_semantics=("parallel", "parallel", "parallel"),
                vmem_limit_bytes=vmem_limit),
        )(x_c, rhs, dm_p)
    else:
        # y-side planes c_i*(y-OFFSET)^i precomputed once (no per-step polynomial or
        # concat work); dm powers precomputed once (the all-ones plane is dropped).
        planes, ypow = [], jnp.ones_like(yf)
        for i in range(NPOW):
            planes.append(COEFS[i] * ypow)
            if i + 1 < NPOW:
                ypow = ypow * yf
        yp = _pad_last(jnp.stack(planes, axis=1).astype(cdtype), Np)   # (G,NPOW,K,Np)

        dmf = decay_mask.astype(jnp.float32)
        dmp = jnp.stack([dmf ** i for i in range(1, NPOW)], axis=0).astype(cdtype)

        def step_bytes(gb, tm, tn, tk):
            blocks = (gb * tm * tk * isz                    # x
                      + gb * NPOW * tk * tn * isz           # y planes
                      + (NPOW - 1) * tm * tk * isz          # dm powers
                      + gb * tm * tn * out_isz)             # out
            scratch = gb * tm * tn * 4                      # f32 accumulator
            temps = gb * tm * tk * isz + 2 * gb * tm * tn * 4
            return 2 * blocks + scratch + temps

        tm = tn = tk = None
        gb = 1
        for tm_c, tn_c, tk_c in (((512, 256, 128), (512, 256, 128), (1024, 512, 256)),
                                 ((256, 128), (256, 128), (512, 256)),
                                 ((128, 64, 32, 16, 8), (128,), (256, 128))):
            tm = _divisor_tile(M, tm_c, 8)
            tn = _divisor_tile(Np, tn_c, 128)
            tk = _divisor_tile(K, tk_c, 128)
            gb = _pick_gb(G, lambda g: step_bytes(g, tm, tn, tk) <= budget)
            if step_bytes(gb, tm, tn, tk) <= budget:
                break
        # TODO(synk): when Np//tn > 1 the x*dm^i products could be cached in a VMEM
        # scratch keyed on the (g, m, k) block (rebuilt under pl.when on the first n
        # step, with n marked 'arbitrary'); for head_dim <= 128 there is one n tile.

        grid = (G // gb, M // tm, Np // tn, K // tk)
        out = pl.pallas_call(
            _av_kernel,
            out_shape=jax.ShapeDtypeStruct((G, M, Np), out_dtype),
            grid=grid,
            in_specs=[
                pl.BlockSpec((gb, tm, tk), lambda g, m, n, k: (g, m, k)),
                pl.BlockSpec((gb, NPOW, tk, tn), lambda g, m, n, k: (g, 0, k, n)),
                pl.BlockSpec((NPOW - 1, tm, tk), lambda g, m, n, k: (0, m, k)),
            ],
            out_specs=pl.BlockSpec((gb, tm, tn), lambda g, m, n, k: (g, m, n)),
            scratch_shapes=[pltpu.VMEM((gb, tm, tn), jnp.float32)],
            compiler_params=pltpu.CompilerParams(
                dimension_semantics=("parallel", "parallel", "parallel", "arbitrary"),
                vmem_limit_bytes=vmem_limit),
        )(x_c, yp, dmp)

    if Np != N:
        out = out[:, :, :N]
    return out


# --- pure-JAX reference (literal translation of the PyTorch loop) -------------
def _reference(x, y, qk_mul, dm):
    y = y - OFFSET
    idx = 0
    basis = None
    for i in range(MAX_ORDER + 1):
        for j in range(MAX_ORDER - i + 1):
            if qk_mul:
                term = jnp.matmul(x, (y ** i) * (X_MAX ** j) * C[idx]) * dm
            else:
                term = jnp.matmul(x * (dm ** i), (y ** i) * (X_MAX ** j) * C[idx])
            basis = term if idx == 0 else basis + term
            idx += 1
    return basis


if __name__ == "__main__":
    key = jax.random.PRNGKey(0)
    B, H, T, D = 2, 2, 16, 32          # batch, heads, seq, head-dim
    G = B * H

    # decay_mask buffer exactly as in the `decay_mask` module:
    # cumsum of a causal mask along dim=-2, minus 1, then decay**that.
    decay_factor = 0.1
    causal = jnp.tril(jnp.ones((T, T), dtype=jnp.float32))
    dm = (np.exp(-decay_factor) ** (jnp.cumsum(causal, axis=-2) - 1.0)).astype(jnp.float32)

    k1, k2, k3, k4 = jax.random.split(key, 4)

    # --- Case 1: QK_mul = True  (x = Q, y = K^T, result is T x T "scores") ----
    q = jax.random.normal(k1, (G, T, D), jnp.float32) * 0.5
    kt = jax.random.normal(k2, (G, D, T), jnp.float32) * 0.5
    out_qk = dram_mac_temporal_encoding(q, kt, True, dm)   # decay_mask is (M,N)=(T,T)
    jax.block_until_ready(out_qk)
    ref_qk = _reference(q, kt, True, dm)
    np.testing.assert_allclose(np.asarray(out_qk), np.asarray(ref_qk),
                               rtol=2e-3, atol=2e-3)

    # --- Case 2: QK_mul = False (x = attention probs, y = V) -----------------
    att = jax.nn.softmax(jax.random.normal(k3, (G, T, T), jnp.float32), axis=-1)
    v = jax.random.normal(k4, (G, T, D), jnp.float32) * 0.5
    out_av = dram_mac_temporal_encoding(att, v, False, dm)  # decay_mask is (M,K)=(T,T)
    jax.block_until_ready(out_av)
    ref_av = _reference(att, v, False, dm)
    np.testing.assert_allclose(np.asarray(out_av), np.asarray(ref_av),
                               rtol=2e-3, atol=2e-3)

    # TODO(synk): add a bf16-input tolerance test (COEFS span 0.5..46 with a sign flip,
    # so bf16 pre-rounding of the polynomial is the most error-sensitive step).
    print("KERNEL_OK")
</pallas_src>

<mosaic_0001>
module attributes {stable_mosaic.version = 11 : i64} {
  func.func @_qk_kernel(%arg0: i32, %arg1: i32, %arg2: i32, %arg3: memref<4x16x32xf32, #tpu.memory_space<vmem>>, %arg4: memref<4x32x128xf32, #tpu.memory_space<vmem>>, %arg5: memref<16x128xf32, #tpu.memory_space<vmem>>, %arg6: memref<4x16x128xf32, #tpu.memory_space<vmem>>) attributes {dimension_semantics = [#tpu.dimension_semantics<parallel>, #tpu.dimension_semantics<parallel>, #tpu.dimension_semantics<parallel>], iteration_bounds = array<i64: 1, 1, 1>, scalar_prefetch = 0 : i64, scratch_operands = 0 : i64, tpu.core_type = #tpu.core_type<tc>, window_params = [{transform_indices = @transform_0, window_bounds = array<i64: 4, 16, 32>}, {transform_indices = @transform_1, window_bounds = array<i64: 4, 32, 128>}, {transform_indices = @transform_2, window_bounds = array<i64: 16, 128>}, {transform_indices = @transform_3, window_bounds = array<i64: 4, 16, 128>}]} {
    %c0 = arith.constant 0 : index
    %c0_0 = arith.constant 0 : index
    %c0_1 = arith.constant 0 : index
    %0 = vector.load %arg3[%c0, %c0_0, %c0_1] : memref<4x16x32xf32, #tpu.memory_space<vmem>>, vector<4x16x32xf32>
    %c0_2 = arith.constant 0 : index
    %c0_3 = arith.constant 0 : index
    %c0_4 = arith.constant 0 : index
    %1 = vector.load %arg4[%c0_2, %c0_3, %c0_4] : memref<4x32x128xf32, #tpu.memory_space<vmem>>, vector<4x32x128xf32>
    "tpu.trace_start"() <{level = 10 : i32, message = "gmk,gkn->gmn"}> : () -> ()
    %cst = arith.constant dense<0.000000e+00> : vector<4x16x128xf32>
    %2 = tpu.matmul %0, %1, %cst {dimension_numbers = #tpu.dot_dimension_numbers<[2], [1], [1], [2], [0, 0, 0, 1, 1, 2], [0], [0]>} : vector<4x16x32xf32>, vector<4x32x128xf32>, vector<4x16x128xf32> -> vector<4x16x128xf32>
    "tpu.trace_stop"() : () -> ()
    %c0_5 = arith.constant 0 : index
    %c0_6 = arith.constant 0 : index
    %3 = vector.load %arg5[%c0_5, %c0_6] : memref<16x128xf32, #tpu.memory_space<vmem>>, vector<16x128xf32>
    %4 = vector.shape_cast %3 : vector<16x128xf32> to vector<1x16x128xf32>
    %5 = vector.broadcast %4 : vector<1x16x128xf32> to vector<4x16x128xf32>
    %6 = arith.mulf %2, %5 : vector<4x16x128xf32>
    %c0_7 = arith.constant 0 : index
    %c0_8 = arith.constant 0 : index
    %c0_9 = arith.constant 0 : index
    %7 = vector.load %arg6[%c0_7, %c0_8, %c0_9] : memref<4x16x128xf32, #tpu.memory_space<vmem>>, vector<4x16x128xf32>
    tpu.vector_store %arg6[%c0_7, %c0_8, %c0_9], %6 {strides = array<i32>} : memref<4x16x128xf32, #tpu.memory_space<vmem>>, vector<4x16x128xf32>,
    return
  }
  func.func @transform_0(%arg0: i32, %arg1: i32, %arg2: i32) -> (i32, i32, i32) {
    %c0_i32 = arith.constant 0 : i32
    %c0_i32_0 = arith.constant 0 : i32
    return %arg0, %arg1, %c0_i32 : i32, i32, i32
  }
  func.func @transform_1(%arg0: i32, %arg1: i32, %arg2: i32) -> (i32, i32, i32) {
    %c0_i32 = arith.constant 0 : i32
    %c0_i32_0 = arith.constant 0 : i32
    return %arg0, %c0_i32, %arg2 : i32, i32, i32
  }
  func.func @transform_2(%arg0: i32, %arg1: i32, %arg2: i32) -> (i32, i32) {
    %c0_i32 = arith.constant 0 : i32
    return %arg1, %arg2 : i32, i32
  }
  func.func @transform_3(%arg0: i32, %arg1: i32, %arg2: i32) -> (i32, i32, i32) {
    %c0_i32 = arith.constant 0 : i32
    return %arg0, %arg1, %arg2 : i32, i32, i32
  }
}

</mosaic_0001>

<bundles_post_ra>
// kernel: tpu_custom_call.1
= control target key start
LH: loop header
LB: loop body
LE: loop exit
PB: predicated region body
PF: predicated region fallthrough
CT: control target
= control target key end

     0   :  { %8 = vsyncpa [#allocation3], 0  ;;  %s750_s0 = inlined_call_operand.hbm [shape: f32[4,16,32], index: 0, kind: input, shape index: {}]   ;;  %s751_s1 = inlined_call_operand.hbm [shape: f32[4,32,128], index: 1, kind: input, shape index: {}]   ;;  %s752_s2 = inlined_call_operand.hbm [shape: f32[16,128], index: 2, kind: input, shape index: {}]   ;;  %s753_s3 = inlined_call_operand.hbm [shape: f32[4,16,128], index: 3, kind: output, shape index: {}]  }
   0x1   :  { %9 = vsyncpa [#allocation6], 0 }
   0x2   :  { %10 = vsyncpa [#allocation4], 0  ;;  %s649_s12 = smov [#allocation5]   ;;  %s650_s14 = smov [#allocation2]  }
   0x3   :  { %s28_s13 = sshll.u32 %s649_s12, 4  ;;  %s16_s15 = sshll.u32 %s650_s14, 4  ;;  %s29_s13 = int_to_ptr.vmem [resolvable:$true] %s28_s13  ;;  %s675_s15 = int_to_ptr.vmem [resolvable:$true] %s16_s15 }
   0x4   :  { %s555_s18 = scalar_lea.hbm %s751_s1, 2048 }
   0x5   :  { %p556_p0 = scmp.ne.s32.totalorder %s751_s1, %s555_s18  ;;  %p559_p1 = scmp.lt.u32.totalorder %s555_s18, %s751_s1 }
   0x7   :  { %p561_p2 = pnand %p559_p1, %p556_p0 }
   0x9   :  { %564 = shalt.err (!%p561_p2)
}
   0xa   :  { %s565_s23 = scalar_lea.vmem %s29_s13, 2048  ;;  %p570_p4 = scmp.lt.s32.totalorder %s29_s13, %s29_s13 }
   0xb   :  { %p566_p3 = scmp.ne.s32.totalorder %s29_s13, %s565_s23  ;;  %p571_p5 = scmp.lt.s32.totalorder %s565_s23, %s565_s23 }
   0xd   :  { %p572_p6 = por %p571_p5, %p570_p4 }
   0xf   :  { %p573_p7 = pnand %p572_p6, %p566_p3 }
  0x11   :  { %576 = shalt.err (!%p573_p7)
}
  0x12   :  { %s651_s24 = smov 128   ;;  %s652_s25 = smov 8  }
  0x13   :  { %34 = dma.hbm_to_vmem [thread:$0]  %s751_s1, 2048, %s29_s13, [#allocation6], %s651_s24, %s651_s24, %s652_s25  }
  0x14   :  { %s577_s30 = scalar_lea.hbm %s750_s0, 1024 }
  0x15   :  { %p578_p8 = scmp.ne.s32.totalorder %s750_s0, %s577_s30  ;;  %p581_p9 = scmp.lt.u32.totalorder %s577_s30, %s750_s0 }
  0x17   :  { %p583_p10 = pnand %p581_p9, %p578_p8 }
  0x19   :  { %586 = shalt.err (!%p583_p10)
}
  0x1a   :  { %s587_s8 = scalar_lea.vmem %s675_s15, 1024  ;;  %p592_p12 = scmp.lt.s32.totalorder %s675_s15, %s675_s15 }
  0x1b   :  { %p588_p11 = scmp.ne.s32.totalorder %s675_s15, %s587_s8  ;;  %p593_p13 = scmp.lt.s32.totalorder %s587_s8, %s587_s8 }
  0x1d   :  { %p594_p0 = por %p593_p13, %p592_p12 }
  0x1f   :  { %p595_p1 = pnand %p594_p0, %p588_p11 }
  0x21   :  { %598 = shalt.err (!%p595_p1)
}
  0x22   :  { %22 = dma.hbm_to_vmem [thread:$0]  %s750_s0, 1024, %s675_s15, [#allocation3], %s651_s24, %s651_s24, %s652_s25  }
  0x23   :  { %s653_s10 = smov [#allocation7]   ;;  %s599_s14 = scalar_lea.hbm %s752_s2, 256 }
  0x24   :  { %s40_s11 = sshll.u32 %s653_s10, 4  ;;  %p600_p2 = scmp.ne.s32.totalorder %s752_s2, %s599_s14  ;;  %s41_s11 = int_to_ptr.vmem [resolvable:$true] %s40_s11 }
  0x25   :  { %p603_p3 = scmp.lt.u32.totalorder %s599_s14, %s752_s2 }
  0x27   :  { %p605_p4 = pnand %p603_p3, %p600_p2 }
  0x29   :  { %608 = shalt.err (!%p605_p4)
}
  0x2a   :  { %s609_s20 = scalar_lea.vmem %s41_s11, 256  ;;  %p614_p6 = scmp.lt.s32.totalorder %s41_s11, %s41_s11 }
  0x2b   :  { %p610_p5 = scmp.ne.s32.totalorder %s41_s11, %s609_s20  ;;  %p615_p7 = scmp.lt.s32.totalorder %s609_s20, %s609_s20 }
  0x2d   :  { %p616_p8 = por %p615_p7, %p614_p6 }
  0x2f   :  { %p617_p9 = pnand %p616_p8, %p610_p5 }
  0x31   :  { %620 = shalt.err (!%p617_p9)
}
  0x32   :  { %46 = dma.hbm_to_vmem [thread:$0]  %s752_s2, 256, %s41_s11, [#allocation6], %s651_s24, %s651_s24, %s652_s25  }
  0x33   :  { %643 = dma.done.wait [#allocation3], 1024  }
  0x34   :  { %644 = vsyncadd [#allocation3], 4294966272 }
  0x35   :  { %645 = dma.done.wait [#allocation6], 2304  }
  0x36   :  { %646 = vsyncadd [#allocation6], 4294964992  ;;  %v64_v0 = vld [vmem:[#allocation5] sm:$0xff]  ;;  %v65_v1 = vld [vmem:[#allocation5 + $0x8] sm:$0xff]  ;;  %vm80_vm0 = vcmask 261120   ;;  %s654_s2 = smov [#allocation8]  }
  0x37   :  { %v68_v2 = vld [vmem:[#allocation5 + $0x20] sm:$0xff]  ;;  %v517_v3 = vpack.c.bf16 %v65_v1, %v64_v0  ;;  %v69_v4 = vld [vmem:[#allocation5 + $0x28] sm:$0xff]  ;;  %v66_v5 = vld [vmem:[#allocation5 + $0x10] sm:$0xff]  ;;  %s428_s21 = sshll.u32 %s654_s2, 4  ;;  %s429_s21 = int_to_ptr.vmem [resolvable:$true] %s428_s21 }
  0x38   :  { %v67_v6 = vld [vmem:[#allocation5 + $0x18] sm:$0xff]  ;;  %v525_v7 = vpack.c.bf16 %v69_v4, %v68_v2  ;;  %v70_v9 = vld [vmem:[#allocation5 + $0x30] sm:$0xff]  ;;  %v56_v11 = vld [vmem:[#allocation2] sm:$0xff]  ;;  %s621_s22 = scalar_lea.vmem %s429_s21, 1024  ;;  %p626_p11 = scmp.lt.s32.totalorder %s429_s21, %s429_s21 }
  0x39   :  { %v521_v8 = vpack.c.bf16 %v67_v6, %v66_v5  ;;  %v71_v10 = vld [vmem:[#allocation5 + $0x38] sm:$0xff]  ;;  %518 = vmatprep.subr.bf16.mxu0 %v517_v3  ;;  %481 = vmatprep.mubr.msk.f32.mxu0 %vm80_vm0, %v56_v11  ;;  %v58_v13 = vld [vmem:[#allocation2 + $0x10] sm:$0xff]  ;;  %v72_v14 = vld [vmem:[#allocation5 + $0x40] sm:$0xff]  ;;  %p622_p10 = scmp.ne.s32.totalorder %s429_s21, %s621_s22  ;;  %p627_p12 = scmp.lt.s32.totalorder %s621_s22, %s621_s22 }
  0x3a   :  { %v529_v12 = vpack.c.bf16 %v71_v10, %v70_v9  ;;  %526 = vmatprep.subr.bf16.mxu1 %v525_v7  ;;  %520 = vmatpush3.bf16.msra.mxu0 %v517_v3  ;;  %v73_v15 = vld [vmem:[#allocation5 + $0x48] sm:$0xff]  ;;  %v76_v16 = vld [vmem:[#allocation5 + $0x60] sm:$0xff]  ;;  %v74_v20 = vld [vmem:[#allocation5 + $0x50] sm:$0xff] }
  0x3b   :  { %528 = vmatpush3.bf16.msra.mxu1 %v525_v7  ;;  %522 = vmatprep.subr.bf16.mxu0 %v521_v8  ;;  %v533_v17 = vpack.c.bf16 %v73_v15, %v72_v14  ;;  %v77_v18 = vld [vmem:[#allocation5 + $0x68] sm:$0xff]  ;;  %v75_v21 = vld [vmem:[#allocation5 + $0x58] sm:$0xff]  ;;  %v78_v22 = vld [vmem:[#allocation5 + $0x70] sm:$0xff]  ;;  %p628_p13 = por %p627_p12, %p626_p11 }
  0x3c   :  { %530 = vmatprep.subr.bf16.mxu1 %v529_v12  ;;  %492 = vmatprep.mubr.msk.f32.mxu1 %vm80_vm0, %v58_v13  ;;  %v541_v19 = vpack.c.bf16 %v77_v18, %v76_v16  ;;  %v79_v23 = vld [vmem:[#allocation5 + $0x78] sm:$0xff]  ;;  %v57_v24 = vld [vmem:[#allocation2 + $0x8] sm:$0xff]  ;;  %v537_v26 = vpack.c.bf16 %v75_v21, %v74_v20  ;;  %v60_v28 = vld [vmem:[#allocation2 + $0x20] sm:$0xff] }
  0x3d   :  { %v59_v25 = vld [vmem:[#allocation2 + $0x18] sm:$0xff]  ;;  %v545_v27 = vpack.c.bf16 %v79_v23, %v78_v22  ;;  %v62_v29 = vld [vmem:[#allocation2 + $0x30] sm:$0xff]  ;;  %v61_v30 = vld [vmem:[#allocation2 + $0x28] sm:$0xff]  ;;  %p629_p0 = pnand %p628_p13, %p622_p10 }
  0x3e   :  { %524 = vmatpush3.bf16.msra.mxu0 %v521_v8  ;;  %v63_v31 = vld [vmem:[#allocation2 + $0x38] sm:$0xff]  ;;  %v406_v32 = vld [vmem:[#allocation7 + $0x8] sm:$0xff]  ;;  %v405_v33 = vld [vmem:[#allocation7] sm:$0xff] }
  0x3f   :  { %532 = vmatpush3.bf16.msra.mxu1 %v529_v12  ;;  %534 = vmatprep.subr.bf16.mxu0 %v533_v17 }
  0x40   :  { %542 = vmatprep.subr.bf16.mxu1 %v541_v19 }
  0x41   :  { %482 = vmatmul.mubr.msk.f32.vlgmr.msra.gmra.mrb[0].mxu0 %vm80_vm0, %v57_v24 }
  0x42   :  { %493 = vmatmul.mubr.msk.f32.vlgmr.msra.gmra.mrb[0].mxu1 %vm80_vm0, %v59_v25  ;;  %536 = vmatpush3.bf16.msra.mxu0 %v533_v17 }
  0x43   :  { %544 = vmatpush3.bf16.msra.mxu1 %v541_v19  ;;  %538 = vmatprep.subr.bf16.mxu0 %v537_v26 }
  0x44   :  { %546 = vmatprep.subr.bf16.mxu1 %v545_v27  ;;  %503 = vmatprep.mubr.msk.f32.mxu0 %vm80_vm0, %v60_v28 }
  0x45   :  { %514 = vmatprep.mubr.msk.f32.mxu1 %vm80_vm0, %v62_v29 }
  0x46   :  { %540 = vmatpush3.bf16.msra.mxu0 %v537_v26 }
  0x47   :  { %548 = vmatpush3.bf16.msra.mxu1 %v545_v27 }
  0x49   :  { %504 = vmatmul.mubr.msk.f32.vlgmr.msra.gmra.mrb[2].mxu0 %vm80_vm0, %v61_v30 }
  0x4a   :  { %515 = vmatmul.mubr.msk.f32.vlgmr.msra.gmra.mrb[2].mxu1 %vm80_vm0, %v63_v31 }
 0x114   :  { %v483_v34 = vpop.f32.mrb[0].mxu0 }
 0x115   :  { %v408_v35 = vmul.f32 %v483_v34, %v406_v32  ;;  %v494_v36 = vpop.f32.mrb[0].mxu1  ;;  %v153_v37 = vpop.f32.mrb[1].mxu0 }
 0x116   :  { %v410_v38 = vmul.f32 %v494_v36, %v406_v32  ;;  %v407_v39 = vmul.f32 %v405_v33, %v153_v37  ;;  %v234_v40 = vpop.f32.mrb[1].mxu1 }
 0x117   :  { %416 = vst [vmem:[#allocation8 + $0x8] sm:$0xff] %v408_v35  ;;  %v409_v41 = vmul.f32 %v405_v33, %v234_v40 }
 0x118   :  { %418 = vst [vmem:[#allocation8 + $0x18] sm:$0xff] %v410_v38  ;;  %415 = vst [vmem:[#allocation8] sm:$0xff] %v407_v39 }
 0x119   :  { %417 = vst [vmem:[#allocation8 + $0x10] sm:$0xff] %v409_v41 }
 0x11c   :  { %v505_v42 = vpop.f32.mrb[2].mxu0 }
 0x11d   :  { %v412_v43 = vmul.f32 %v505_v42, %v406_v32  ;;  %v516_v44 = vpop.f32.mrb[2].mxu1  ;;  %v315_v45 = vpop.f32.mrb[3].mxu0 }
 0x11e   :  { %v414_v46 = vmul.f32 %v516_v44, %v406_v32  ;;  %v411_v47 = vmul.f32 %v405_v33, %v315_v45  ;;  %v396_v48 = vpop.f32.mrb[3].mxu1 }
 0x11f   :  { %420 = vst [vmem:[#allocation8 + $0x28] sm:$0xff] %v412_v43  ;;  %v413_v49 = vmul.f32 %v405_v33, %v396_v48 }
 0x120   :  { %422 = vst [vmem:[#allocation8 + $0x38] sm:$0xff] %v414_v46  ;;  %419 = vst [vmem:[#allocation8 + $0x20] sm:$0xff] %v411_v47 }
 0x121   :  { %421 = vst [vmem:[#allocation8 + $0x30] sm:$0xff] %v413_v49 }
 0x122   :  { %632 = shalt.err (!%p629_p0)
}
 0x123   :  { %s633_s27 = scalar_lea.hbm %s753_s3, 1024 }
 0x124   :  { %p634_p1 = scmp.ne.s32.totalorder %s753_s3, %s633_s27  ;;  %p637_p2 = scmp.lt.u32.totalorder %s633_s27, %s753_s3 }
 0x126   :  { %p639_p3 = pnand %p637_p2, %p634_p1 }
 0x128   :  { %642 = shalt.err (!%p639_p3)
}
 0x129   :  { %434 = dma.vmem_to_hbm [thread:$0]  %s429_s21, 1024, %s753_s3, [#allocation4], %s651_s24, %s651_s24, %s652_s25  }
 0x12a   :  { %647 = dma.done.wait [#allocation4], 1024  }
 0x12b   :  { %648 = vsyncadd [#allocation4], 4294966272 }
 0x12c   :  { %438 = vsyncpa [#allocation3], 1 }
 0x12d   :  { %439 = vsyncpa [#allocation6], 1 }
 0x12e   :  { %440 = vsyncpa [#allocation4], 1 }

</bundles_post_ra>
